<compile_context>
chip_gen: v6e
topology: v6e:2x2x1
jax: 0.10.0
libtpu: 0.0.40
codegen_flags: <defaults>
</compile_context>

<pallas_src>
import math

import jax
import jax.numpy as jnp
import numpy as np
from jax import lax
from jax.experimental import pallas as pl
from jax.experimental.pallas import tpu as pltpu

# ----------------------------- config (small) ------------------------------
HIDDEN = 32          # config.hidden_size
NUM_HEADS = 4        # config.num_attention_heads
HEAD_DIM = HIDDEN // NUM_HEADS
INTERMEDIATE = 64    # config.intermediate_size
SEQ = 8
BATCH = 2
LN_EPS = 1e-5        # nn.LayerNorm default
BS = BATCH * SEQ
NEG_INF = -1e30

# --------------------- parameter-slab row layout (static) -------------------
# One (SLAB_ROWS, 128) f32 slab. Every region starts at lane 0 and at a
# sublane offset that is a multiple of 8, so every in-kernel unpack is a cheap
# aligned static slice.
ROW_WQKV = 0                        # (3H, H)  [wq.T ; wk.T ; wv.T] (q pre-scaled)
ROW_BQKV = ROW_WQKV + 3 * HIDDEN    # (3H, BS) qkv bias columns, pre-broadcast
ROW_WO = ROW_BQKV + 3 * HIDDEN      # (H, H)   output projection (natural layout)
ROW_W1 = ROW_WO + HIDDEN            # (H, I)
ROW_W2 = ROW_W1 + HIDDEN            # (I, H)
ROW_MASK = ROW_W2 + INTERMEDIATE    # (BS, BS) additive block-diagonal batch bias
ROW_VEC = ROW_MASK + BS             # 8 rows: row0 = [b_o | b1 | b2], row1 = LN g/b
SLAB_ROWS = ROW_VEC + 8             # = 344


# ------------------------------- kernel -------------------------------------
def encoder_layer_kernel(x_ref, p_ref, o_ref, ctx_ref):
    H, I, HD, NH = HIDDEN, INTERMEDIATE, HEAD_DIM, NUM_HEADS

    x = x_ref[...]                                        # (BS, H)

    # ---- static, sublane-aligned unpack of the single parameter slab ----
    w_qkvT = p_ref[ROW_WQKV:ROW_WQKV + 3 * H, 0:H]        # (3H, H)
    b_qkvT = p_ref[ROW_BQKV:ROW_BQKV + 3 * H, 0:BS]       # (3H, BS)
    w_o = p_ref[ROW_WO:ROW_WO + H, 0:H]                   # (H, H)
    w1 = p_ref[ROW_W1:ROW_W1 + H, 0:I]                    # (H, I)
    w2 = p_ref[ROW_W2:ROW_W2 + I, 0:H]                    # (I, H)
    mask = p_ref[ROW_MASK:ROW_MASK + BS, 0:BS]            # (BS, BS)
    vec = p_ref[ROW_VEC:ROW_VEC + 8, :]                   # (8, 128)

    b_o = vec[0:1, 0:H]
    b1 = vec[0:1, H:H + I]
    b2 = vec[0:1, H + I:2 * H + I]
    ln1_g = vec[1:2, 0:H]
    ln1_b = vec[1:2, H:2 * H]
    ln2_g = vec[1:2, 2 * H:3 * H]
    ln2_b = vec[1:2, 3 * H:4 * H]

    def layernorm(v, g, b):
        # One-pass stats: E[v] and E[v^2] are independent reductions, so the
        # two XLU reduces can overlap instead of chaining mean -> centered sq.
        mu = jnp.mean(v, axis=-1, keepdims=True)
        ms = jnp.mean(v * v, axis=-1, keepdims=True)
        var = ms - mu * mu
        return (v - mu) * lax.rsqrt(var + LN_EPS) * g + b

    # ---------------------- multi-head self attention -----------------------
    h = layernorm(x, ln1_g, ln1_b)                        # (BS, H)

    # Fused QKV in feature-on-sublane layout:
    #   qkvT[f, i] = sum_c w_qkvT[f, c] * h[i, c]   -> (3H, BS)
    # (the 1/sqrt(HD) score scale is already folded into the packed wq / bq).
    qkvT = lax.dot_general(w_qkvT, h, (((1,), (1,)), ((), ())),
                           preferred_element_type=jnp.float32) + b_qkvT

    # Static unroll over heads: every q/k/v slice is a sublane-aligned view.
    # (At scale on v5e, consider a single batched dot_general over heads.)
    for hd in range(NH):
        r = hd * HD
        qhT = qkvT[r:r + HD, :]                           # (HD, BS)
        khT = qkvT[H + r:H + r + HD, :]                   # (HD, BS)
        vhT = qkvT[2 * H + r:2 * H + r + HD, :]           # (HD, BS)

        # s[i, j] = q_i . k_j  (contract the head dim, which sits on sublanes)
        s = lax.dot_general(qhT, khT, (((0,), (0,)), ((), ())),
                            preferred_element_type=jnp.float32)
        s = s + mask                                      # block-diag batch bias
        s = s - jnp.max(s, axis=-1, keepdims=True)
        p = jnp.exp(s)
        p = p / jnp.sum(p, axis=-1, keepdims=True)        # exact divide

        # hoT[d, i] = sum_j vhT[d, j] * p[i, j]   -> (HD, BS),
        # stored sublane-aligned into the (H, BS) context scratch.
        ctx_ref[r:r + HD, :] = lax.dot_general(
            vhT, p, (((1,), (1,)), ((), ())),
            preferred_element_type=jnp.float32)

    # Single output projection over all heads:
    #   attn[i, o] = sum_c ctxT[c, i] * w_o[c, o]   -> (BS, H)
    attn = lax.dot_general(ctx_ref[...], w_o, (((0,), (0,)), ((), ())),
                           preferred_element_type=jnp.float32) + b_o

    x1 = x + attn                                         # residual 1

    # ------------------------------ feed forward -----------------------------
    h2 = layernorm(x1, ln2_g, ln2_b)
    ff = jnp.dot(h2, w1, preferred_element_type=jnp.float32) + b1
    # exact GELU (nn.GELU default): 0.5 * x * (1 + erf(x / sqrt(2)))
    ff = 0.5 * ff * (1.0 + lax.erf(ff * (1.0 / math.sqrt(2.0))))
    ff = jnp.dot(ff, w2, preferred_element_type=jnp.float32) + b2
    # TODO(synk): nn.Dropout is identity in eval mode; not applied here.

    o_ref[...] = x1 + ff                                  # residual 2


# -------------------------- one-time parameter packing -----------------------
def pack_params(params):
    """Pack the 17 small parameters into one (SLAB_ROWS, 128) f32 slab.

    Runs ONCE at init (numpy, outside jit): nothing here is on the per-call
    hot path.
    """
    H, I = HIDDEN, INTERMEDIATE
    slab = np.zeros((SLAB_ROWS, 128), np.float32)

    inv_sqrt_d = 1.0 / math.sqrt(HEAD_DIM)
    wq = np.asarray(params["wq"]) * inv_sqrt_d            # fold score scale into q
    bq = np.asarray(params["bq"]).reshape(-1) * inv_sqrt_d
    wk = np.asarray(params["wk"])
    bk = np.asarray(params["bk"]).reshape(-1)
    wv = np.asarray(params["wv"])
    bv = np.asarray(params["bv"]).reshape(-1)

    slab[ROW_WQKV:ROW_WQKV + 3 * H, 0:H] = np.concatenate([wq.T, wk.T, wv.T], 0)
    b_qkv = np.concatenate([bq, bk, bv], 0)               # (3H,)
    slab[ROW_BQKV:ROW_BQKV + 3 * H, 0:BS] = b_qkv[:, None]  # pre-broadcast columns

    slab[ROW_WO:ROW_WO + H, 0:H] = np.asarray(params["wo"])
    slab[ROW_W1:ROW_W1 + H, 0:I] = np.asarray(params["w1"])
    slab[ROW_W2:ROW_W2 + I, 0:H] = np.asarray(params["w2"])

    # Additive block-diagonal mask: rows of the flattened (B*S) activation only
    # attend within their own batch element.
    rb = np.arange(BS)[:, None] // SEQ
    cb = np.arange(BS)[None, :] // SEQ
    slab[ROW_MASK:ROW_MASK + BS, 0:BS] = np.where(rb == cb, 0.0, NEG_INF)

    slab[ROW_VEC, 0:H] = np.asarray(params["bo"]).reshape(-1)
    slab[ROW_VEC, H:H + I] = np.asarray(params["b1"]).reshape(-1)
    slab[ROW_VEC, H + I:2 * H + I] = np.asarray(params["b2"]).reshape(-1)
    slab[ROW_VEC + 1, 0:H] = np.asarray(params["ln1_g"]).reshape(-1)
    slab[ROW_VEC + 1, H:2 * H] = np.asarray(params["ln1_b"]).reshape(-1)
    slab[ROW_VEC + 1, 2 * H:3 * H] = np.asarray(params["ln2_g"]).reshape(-1)
    slab[ROW_VEC + 1, 3 * H:4 * H] = np.asarray(params["ln2_b"]).reshape(-1)
    return jnp.asarray(slab)


# --------------------------------- wrapper -----------------------------------
@jax.jit
def transformer_encoder_layer(x, slab):
    B, S, H = x.shape
    x2d = x.reshape(B * S, H)          # free: contiguous leading-dim merge
    out2d = pl.pallas_call(
        encoder_layer_kernel,
        out_shape=jax.ShapeDtypeStruct((B * S, H), jnp.float32),
        scratch_shapes=[pltpu.VMEM((H, B * S), jnp.float32)],   # ctxT scratch
    )(x2d, slab)
    return out2d.reshape(B, S, H)


# ----------------------------- pure-JAX reference ----------------------------
def ref_forward(x, p):
    def ln(v, g, b):
        mu = v.mean(-1, keepdims=True)
        var = ((v - mu) ** 2).mean(-1, keepdims=True)
        return (v - mu) / jnp.sqrt(var + LN_EPS) * g + b

    h = ln(x, p["ln1_g"], p["ln1_b"])
    q = h @ p["wq"] + p["bq"]
    k = h @ p["wk"] + p["bk"]
    v = h @ p["wv"] + p["bv"]
    outs = []
    for hd in range(NUM_HEADS):
        sl = slice(hd * HEAD_DIM, (hd + 1) * HEAD_DIM)
        qh, kh, vh = q[..., sl], k[..., sl], v[..., sl]
        scores = jnp.einsum("bsd,btd->bst", qh, kh) / math.sqrt(HEAD_DIM)
        w = jax.nn.softmax(scores, axis=-1)
        outs.append(jnp.einsum("bst,btd->bsd", w, vh))
    attn = jnp.concatenate(outs, axis=-1) @ p["wo"] + p["bo"]
    x1 = x + attn
    h2 = ln(x1, p["ln2_g"], p["ln2_b"])
    ff = h2 @ p["w1"] + p["b1"]
    ff = 0.5 * ff * (1.0 + jax.lax.erf(ff / math.sqrt(2.0)))
    ff = ff @ p["w2"] + p["b2"]
    return x1 + ff


# ----------------------------------- main ------------------------------------
def make_params(key):
    ks = jax.random.split(key, 12)
    s = 0.05
    params = {
        "ln1_g": jnp.ones((1, HIDDEN), jnp.float32),
        "ln1_b": jnp.zeros((1, HIDDEN), jnp.float32),
        "ln2_g": jnp.ones((1, HIDDEN), jnp.float32),
        "ln2_b": jnp.zeros((1, HIDDEN), jnp.float32),
        # per-head q/k/v linears concatenated along the output dim,
        # pre-transposed to (in, out):
        "wq": s * jax.random.normal(ks[0], (HIDDEN, HIDDEN), jnp.float32),
        "bq": s * jax.random.normal(ks[1], (1, HIDDEN), jnp.float32),
        "wk": s * jax.random.normal(ks[2], (HIDDEN, HIDDEN), jnp.float32),
        "bk": s * jax.random.normal(ks[3], (1, HIDDEN), jnp.float32),
        "wv": s * jax.random.normal(ks[4], (HIDDEN, HIDDEN), jnp.float32),
        "bv": s * jax.random.normal(ks[5], (1, HIDDEN), jnp.float32),
        "wo": s * jax.random.normal(ks[6], (HIDDEN, HIDDEN), jnp.float32),
        "bo": s * jax.random.normal(ks[7], (1, HIDDEN), jnp.float32),
        "w1": s * jax.random.normal(ks[8], (HIDDEN, INTERMEDIATE), jnp.float32),
        "b1": s * jax.random.normal(ks[9], (1, INTERMEDIATE), jnp.float32),
        "w2": s * jax.random.normal(ks[10], (INTERMEDIATE, HIDDEN), jnp.float32),
        "b2": s * jax.random.normal(ks[11], (1, HIDDEN), jnp.float32),
    }
    return params


if __name__ == "__main__":
    key = jax.random.PRNGKey(0)
    kx, kp = jax.random.split(key)
    x = jax.random.normal(kx, (BATCH, SEQ, HIDDEN), jnp.float32)
    params = make_params(kp)

    # Parameter packing happens ONCE here, not per forward call.
    slab = jax.block_until_ready(pack_params(params))

    out = transformer_encoder_layer(x, slab)
    out = jax.block_until_ready(out)

    ref = jax.block_until_ready(ref_forward(x, params))
    # The softmax now uses an exact divide (the approx reciprocal was the
    # flagged accuracy issue); the remaining tolerance only covers matmul
    # default-precision / reduction-order differences vs. the XLA reference.
    np.testing.assert_allclose(np.asarray(out), np.asarray(ref),
                               rtol=1e-3, atol=1e-3)
    print("KERNEL_OK")
</pallas_src>

<mosaic_0001>
module attributes {stable_mosaic.version = 11 : i64} {
  func.func @encoder_layer_kernel(%arg0: memref<16x32xf32, #tpu.memory_space<vmem>>, %arg1: memref<344x128xf32, #tpu.memory_space<vmem>>, %arg2: memref<16x32xf32, #tpu.memory_space<vmem>>, %arg3: memref<32x16xf32, #tpu.memory_space<vmem>>) attributes {dimension_semantics = [], scalar_prefetch = 0 : i64, scratch_operands = 1 : i64, tpu.core_type = #tpu.core_type<tc>} {
    %c0 = arith.constant 0 : index
    %c0_0 = arith.constant 0 : index
    %0 = vector.load %arg0[%c0, %c0_0] : memref<16x32xf32, #tpu.memory_space<vmem>>, vector<16x32xf32>
    %c0_1 = arith.constant 0 : index
    %c0_2 = arith.constant 0 : index
    %1 = vector.load %arg1[%c0_1, %c0_2] : memref<344x128xf32, #tpu.memory_space<vmem>>, vector<96x32xf32>
    %c96 = arith.constant 96 : index
    %c0_3 = arith.constant 0 : index
    %2 = vector.load %arg1[%c96, %c0_3] : memref<344x128xf32, #tpu.memory_space<vmem>>, vector<96x16xf32>
    %c192 = arith.constant 192 : index
    %c0_4 = arith.constant 0 : index
    %3 = vector.load %arg1[%c192, %c0_4] : memref<344x128xf32, #tpu.memory_space<vmem>>, vector<32x32xf32>
    %c224 = arith.constant 224 : index
    %c0_5 = arith.constant 0 : index
    %4 = vector.load %arg1[%c224, %c0_5] : memref<344x128xf32, #tpu.memory_space<vmem>>, vector<32x64xf32>
    %c256 = arith.constant 256 : index
    %c0_6 = arith.constant 0 : index
    %5 = vector.load %arg1[%c256, %c0_6] : memref<344x128xf32, #tpu.memory_space<vmem>>, vector<64x32xf32>
    %c320 = arith.constant 320 : index
    %c0_7 = arith.constant 0 : index
    %6 = vector.load %arg1[%c320, %c0_7] : memref<344x128xf32, #tpu.memory_space<vmem>>, vector<16x16xf32>
    %c336 = arith.constant 336 : index
    %c0_8 = arith.constant 0 : index
    %7 = vector.load %arg1[%c336, %c0_8] : memref<344x128xf32, #tpu.memory_space<vmem>>, vector<8x128xf32>
    %8 = vector.extract_strided_slice %7 {offsets = [0, 0], sizes = [1, 32], strides = [1, 1]} : vector<8x128xf32> to vector<1x32xf32>
    %9 = vector.extract_strided_slice %7 {offsets = [0, 32], sizes = [1, 64], strides = [1, 1]} : vector<8x128xf32> to vector<1x64xf32>
    %10 = vector.extract_strided_slice %7 {offsets = [0, 96], sizes = [1, 32], strides = [1, 1]} : vector<8x128xf32> to vector<1x32xf32>
    %11 = vector.extract_strided_slice %7 {offsets = [1, 0], sizes = [1, 32], strides = [1, 1]} : vector<8x128xf32> to vector<1x32xf32>
    %12 = vector.extract_strided_slice %7 {offsets = [1, 32], sizes = [1, 32], strides = [1, 1]} : vector<8x128xf32> to vector<1x32xf32>
    %13 = vector.extract_strided_slice %7 {offsets = [1, 64], sizes = [1, 32], strides = [1, 1]} : vector<8x128xf32> to vector<1x32xf32>
    %14 = vector.extract_strided_slice %7 {offsets = [1, 96], sizes = [1, 32], strides = [1, 1]} : vector<8x128xf32> to vector<1x32xf32>
    %cst = arith.constant dense<0.000000e+00> : vector<16xf32>
    %15 = vector.multi_reduction <add>, %0, %cst [1] : vector<16x32xf32> to vector<16xf32>
    %16 = vector.shape_cast %15 : vector<16xf32> to vector<16x1xf32>
    %cst_9 = arith.constant 3.200000e+01 : f32
    %17 = vector.broadcast %cst_9 : f32 to vector<16x1xf32>
    %18 = arith.divf %16, %17 : vector<16x1xf32>
    %19 = arith.mulf %0, %0 : vector<16x32xf32>
    %cst_10 = arith.constant dense<0.000000e+00> : vector<16xf32>
    %20 = vector.multi_reduction <add>, %19, %cst_10 [1] : vector<16x32xf32> to vector<16xf32>
    %21 = vector.shape_cast %20 : vector<16xf32> to vector<16x1xf32>
    %cst_11 = arith.constant 3.200000e+01 : f32
    %22 = vector.broadcast %cst_11 : f32 to vector<16x1xf32>
    %23 = arith.divf %21, %22 : vector<16x1xf32>
    %24 = arith.mulf %18, %18 : vector<16x1xf32>
    %25 = arith.subf %23, %24 : vector<16x1xf32>
    %26 = vector.broadcast %18 : vector<16x1xf32> to vector<16x32xf32>
    %27 = arith.subf %0, %26 : vector<16x32xf32>
    %cst_12 = arith.constant 9.99999974E-6 : f32
    %28 = vector.broadcast %cst_12 : f32 to vector<16x1xf32>
    %29 = arith.addf %25, %28 : vector<16x1xf32>
    %30 = math.rsqrt %29 : vector<16x1xf32>
    %31 = vector.broadcast %30 : vector<16x1xf32> to vector<16x32xf32>
    %32 = arith.mulf %27, %31 : vector<16x32xf32>
    %33 = vector.broadcast %11 : vector<1x32xf32> to vector<16x32xf32>
    %34 = arith.mulf %32, %33 : vector<16x32xf32>
    %35 = vector.broadcast %12 : vector<1x32xf32> to vector<16x32xf32>
    %36 = arith.addf %34, %35 : vector<16x32xf32>
    %cst_13 = arith.constant dense<0.000000e+00> : vector<96x16xf32>
    %37 = tpu.matmul %1, %36, %cst_13 {dimension_numbers = #tpu.dot_dimension_numbers<[1], [1], [0], [0], [0, 0, 1, 0], [], []>} : vector<96x32xf32>, vector<16x32xf32>, vector<96x16xf32> -> vector<96x16xf32>
    %38 = arith.addf %37, %2 : vector<96x16xf32>
    %39 = vector.extract_strided_slice %38 {offsets = [0, 0], sizes = [8, 16], strides = [1, 1]} : vector<96x16xf32> to vector<8x16xf32>
    %40 = vector.extract_strided_slice %38 {offsets = [32, 0], sizes = [8, 16], strides = [1, 1]} : vector<96x16xf32> to vector<8x16xf32>
    %41 = vector.extract_strided_slice %38 {offsets = [64, 0], sizes = [8, 16], strides = [1, 1]} : vector<96x16xf32> to vector<8x16xf32>
    %cst_14 = arith.constant dense<0.000000e+00> : vector<16x16xf32>
    %42 = tpu.matmul %39, %40, %cst_14 {dimension_numbers = #tpu.dot_dimension_numbers<[0], [0], [1], [1], [0, 1, 1, 1], [], []>} : vector<8x16xf32>, vector<8x16xf32>, vector<16x16xf32> -> vector<16x16xf32>
    %43 = arith.addf %42, %6 : vector<16x16xf32>
    %cst_15 = arith.constant dense<0xFF800000> : vector<16xf32>
    %44 = vector.multi_reduction <maximumf>, %43, %cst_15 [1] : vector<16x16xf32> to vector<16xf32>
    %45 = vector.shape_cast %44 : vector<16xf32> to vector<16x1xf32>
    %46 = vector.broadcast %45 : vector<16x1xf32> to vector<16x16xf32>
    %47 = arith.subf %43, %46 : vector<16x16xf32>
    %48 = math.exp %47 : vector<16x16xf32>
    %cst_16 = arith.constant dense<0.000000e+00> : vector<16xf32>
    %49 = vector.multi_reduction <add>, %48, %cst_16 [1] : vector<16x16xf32> to vector<16xf32>
    %50 = vector.shape_cast %49 : vector<16xf32> to vector<16x1xf32>
    %51 = vector.broadcast %50 : vector<16x1xf32> to vector<16x16xf32>
    %52 = arith.divf %48, %51 : vector<16x16xf32>
    %cst_17 = arith.constant dense<0.000000e+00> : vector<8x16xf32>
    %53 = tpu.matmul %41, %52, %cst_17 {dimension_numbers = #tpu.dot_dimension_numbers<[1], [1], [0], [0], [0, 0, 1, 0], [], []>} : vector<8x16xf32>, vector<16x16xf32>, vector<8x16xf32> -> vector<8x16xf32>
    %c0_18 = arith.constant 0 : index
    %c0_19 = arith.constant 0 : index
    %54 = vector.load %arg3[%c0_18, %c0_19] : memref<32x16xf32, #tpu.memory_space<vmem>>, vector<8x16xf32>
    tpu.vector_store %arg3[%c0_18, %c0_19], %53 {strides = array<i32>} : memref<32x16xf32, #tpu.memory_space<vmem>>, vector<8x16xf32>,
    %55 = vector.extract_strided_slice %38 {offsets = [8, 0], sizes = [8, 16], strides = [1, 1]} : vector<96x16xf32> to vector<8x16xf32>
    %56 = vector.extract_strided_slice %38 {offsets = [40, 0], sizes = [8, 16], strides = [1, 1]} : vector<96x16xf32> to vector<8x16xf32>
    %57 = vector.extract_strided_slice %38 {offsets = [72, 0], sizes = [8, 16], strides = [1, 1]} : vector<96x16xf32> to vector<8x16xf32>
    %cst_20 = arith.constant dense<0.000000e+00> : vector<16x16xf32>
    %58 = tpu.matmul %55, %56, %cst_20 {dimension_numbers = #tpu.dot_dimension_numbers<[0], [0], [1], [1], [0, 1, 1, 1], [], []>} : vector<8x16xf32>, vector<8x16xf32>, vector<16x16xf32> -> vector<16x16xf32>
    %59 = arith.addf %58, %6 : vector<16x16xf32>
    %cst_21 = arith.constant dense<0xFF800000> : vector<16xf32>
    %60 = vector.multi_reduction <maximumf>, %59, %cst_21 [1] : vector<16x16xf32> to vector<16xf32>
    %61 = vector.shape_cast %60 : vector<16xf32> to vector<16x1xf32>
    %62 = vector.broadcast %61 : vector<16x1xf32> to vector<16x16xf32>
    %63 = arith.subf %59, %62 : vector<16x16xf32>
    %64 = math.exp %63 : vector<16x16xf32>
    %cst_22 = arith.constant dense<0.000000e+00> : vector<16xf32>
    %65 = vector.multi_reduction <add>, %64, %cst_22 [1] : vector<16x16xf32> to vector<16xf32>
    %66 = vector.shape_cast %65 : vector<16xf32> to vector<16x1xf32>
    %67 = vector.broadcast %66 : vector<16x1xf32> to vector<16x16xf32>
    %68 = arith.divf %64, %67 : vector<16x16xf32>
    %cst_23 = arith.constant dense<0.000000e+00> : vector<8x16xf32>
    %69 = tpu.matmul %57, %68, %cst_23 {dimension_numbers = #tpu.dot_dimension_numbers<[1], [1], [0], [0], [0, 0, 1, 0], [], []>} : vector<8x16xf32>, vector<16x16xf32>, vector<8x16xf32> -> vector<8x16xf32>
    %c8 = arith.constant 8 : index
    %c0_24 = arith.constant 0 : index
    %70 = vector.load %arg3[%c8, %c0_24] : memref<32x16xf32, #tpu.memory_space<vmem>>, vector<8x16xf32>
    tpu.vector_store %arg3[%c8, %c0_24], %69 {strides = array<i32>} : memref<32x16xf32, #tpu.memory_space<vmem>>, vector<8x16xf32>,
    %71 = vector.extract_strided_slice %38 {offsets = [16, 0], sizes = [8, 16], strides = [1, 1]} : vector<96x16xf32> to vector<8x16xf32>
    %72 = vector.extract_strided_slice %38 {offsets = [48, 0], sizes = [8, 16], strides = [1, 1]} : vector<96x16xf32> to vector<8x16xf32>
    %73 = vector.extract_strided_slice %38 {offsets = [80, 0], sizes = [8, 16], strides = [1, 1]} : vector<96x16xf32> to vector<8x16xf32>
    %cst_25 = arith.constant dense<0.000000e+00> : vector<16x16xf32>
    %74 = tpu.matmul %71, %72, %cst_25 {dimension_numbers = #tpu.dot_dimension_numbers<[0], [0], [1], [1], [0, 1, 1, 1], [], []>} : vector<8x16xf32>, vector<8x16xf32>, vector<16x16xf32> -> vector<16x16xf32>
    %75 = arith.addf %74, %6 : vector<16x16xf32>
    %cst_26 = arith.constant dense<0xFF800000> : vector<16xf32>
    %76 = vector.multi_reduction <maximumf>, %75, %cst_26 [1] : vector<16x16xf32> to vector<16xf32>
    %77 = vector.shape_cast %76 : vector<16xf32> to vector<16x1xf32>
    %78 = vector.broadcast %77 : vector<16x1xf32> to vector<16x16xf32>
    %79 = arith.subf %75, %78 : vector<16x16xf32>
    %80 = math.exp %79 : vector<16x16xf32>
    %cst_27 = arith.constant dense<0.000000e+00> : vector<16xf32>
    %81 = vector.multi_reduction <add>, %80, %cst_27 [1] : vector<16x16xf32> to vector<16xf32>
    %82 = vector.shape_cast %81 : vector<16xf32> to vector<16x1xf32>
    %83 = vector.broadcast %82 : vector<16x1xf32> to vector<16x16xf32>
    %84 = arith.divf %80, %83 : vector<16x16xf32>
    %cst_28 = arith.constant dense<0.000000e+00> : vector<8x16xf32>
    %85 = tpu.matmul %73, %84, %cst_28 {dimension_numbers = #tpu.dot_dimension_numbers<[1], [1], [0], [0], [0, 0, 1, 0], [], []>} : vector<8x16xf32>, vector<16x16xf32>, vector<8x16xf32> -> vector<8x16xf32>
    %c16 = arith.constant 16 : index
    %c0_29 = arith.constant 0 : index
    %86 = vector.load %arg3[%c16, %c0_29] : memref<32x16xf32, #tpu.memory_space<vmem>>, vector<8x16xf32>
    tpu.vector_store %arg3[%c16, %c0_29], %85 {strides = array<i32>} : memref<32x16xf32, #tpu.memory_space<vmem>>, vector<8x16xf32>,
    %87 = vector.extract_strided_slice %38 {offsets = [24, 0], sizes = [8, 16], strides = [1, 1]} : vector<96x16xf32> to vector<8x16xf32>
    %88 = vector.extract_strided_slice %38 {offsets = [56, 0], sizes = [8, 16], strides = [1, 1]} : vector<96x16xf32> to vector<8x16xf32>
    %89 = vector.extract_strided_slice %38 {offsets = [88, 0], sizes = [8, 16], strides = [1, 1]} : vector<96x16xf32> to vector<8x16xf32>
    %cst_30 = arith.constant dense<0.000000e+00> : vector<16x16xf32>
    %90 = tpu.matmul %87, %88, %cst_30 {dimension_numbers = #tpu.dot_dimension_numbers<[0], [0], [1], [1], [0, 1, 1, 1], [], []>} : vector<8x16xf32>, vector<8x16xf32>, vector<16x16xf32> -> vector<16x16xf32>
    %91 = arith.addf %90, %6 : vector<16x16xf32>
    %cst_31 = arith.constant dense<0xFF800000> : vector<16xf32>
    %92 = vector.multi_reduction <maximumf>, %91, %cst_31 [1] : vector<16x16xf32> to vector<16xf32>
    %93 = vector.shape_cast %92 : vector<16xf32> to vector<16x1xf32>
    %94 = vector.broadcast %93 : vector<16x1xf32> to vector<16x16xf32>
    %95 = arith.subf %91, %94 : vector<16x16xf32>
    %96 = math.exp %95 : vector<16x16xf32>
    %cst_32 = arith.constant dense<0.000000e+00> : vector<16xf32>
    %97 = vector.multi_reduction <add>, %96, %cst_32 [1] : vector<16x16xf32> to vector<16xf32>
    %98 = vector.shape_cast %97 : vector<16xf32> to vector<16x1xf32>
    %99 = vector.broadcast %98 : vector<16x1xf32> to vector<16x16xf32>
    %100 = arith.divf %96, %99 : vector<16x16xf32>
    %cst_33 = arith.constant dense<0.000000e+00> : vector<8x16xf32>
    %101 = tpu.matmul %89, %100, %cst_33 {dimension_numbers = #tpu.dot_dimension_numbers<[1], [1], [0], [0], [0, 0, 1, 0], [], []>} : vector<8x16xf32>, vector<16x16xf32>, vector<8x16xf32> -> vector<8x16xf32>
    %c24 = arith.constant 24 : index
    %c0_34 = arith.constant 0 : index
    %102 = vector.load %arg3[%c24, %c0_34] : memref<32x16xf32, #tpu.memory_space<vmem>>, vector<8x16xf32>
    tpu.vector_store %arg3[%c24, %c0_34], %101 {strides = array<i32>} : memref<32x16xf32, #tpu.memory_space<vmem>>, vector<8x16xf32>,
    %c0_35 = arith.constant 0 : index
    %c0_36 = arith.constant 0 : index
    %103 = vector.load %arg3[%c0_35, %c0_36] : memref<32x16xf32, #tpu.memory_space<vmem>>, vector<32x16xf32>
    %cst_37 = arith.constant dense<0.000000e+00> : vector<16x32xf32>
    %104 = tpu.matmul %103, %3, %cst_37 {dimension_numbers = #tpu.dot_dimension_numbers<[0], [0], [1], [1], [0, 1, 1, 1], [], []>} : vector<32x16xf32>, vector<32x32xf32>, vector<16x32xf32> -> vector<16x32xf32>
    %105 = vector.broadcast %8 : vector<1x32xf32> to vector<16x32xf32>
    %106 = arith.addf %104, %105 : vector<16x32xf32>
    %107 = arith.addf %0, %106 : vector<16x32xf32>
    %cst_38 = arith.constant dense<0.000000e+00> : vector<16xf32>
    %108 = vector.multi_reduction <add>, %107, %cst_38 [1] : vector<16x32xf32> to vector<16xf32>
    %109 = vector.shape_cast %108 : vector<16xf32> to vector<16x1xf32>
    %cst_39 = arith.constant 3.200000e+01 : f32
    %110 = vector.broadcast %cst_39 : f32 to vector<16x1xf32>
    %111 = arith.divf %109, %110 : vector<16x1xf32>
    %112 = arith.mulf %107, %107 : vector<16x32xf32>
    %cst_40 = arith.constant dense<0.000000e+00> : vector<16xf32>
    %113 = vector.multi_reduction <add>, %112, %cst_40 [1] : vector<16x32xf32> to vector<16xf32>
    %114 = vector.shape_cast %113 : vector<16xf32> to vector<16x1xf32>
    %cst_41 = arith.constant 3.200000e+01 : f32
    %115 = vector.broadcast %cst_41 : f32 to vector<16x1xf32>
    %116 = arith.divf %114, %115 : vector<16x1xf32>
    %117 = arith.mulf %111, %111 : vector<16x1xf32>
    %118 = arith.subf %116, %117 : vector<16x1xf32>
    %119 = vector.broadcast %111 : vector<16x1xf32> to vector<16x32xf32>
    %120 = arith.subf %107, %119 : vector<16x32xf32>
    %cst_42 = arith.constant 9.99999974E-6 : f32
    %121 = vector.broadcast %cst_42 : f32 to vector<16x1xf32>
    %122 = arith.addf %118, %121 : vector<16x1xf32>
    %123 = math.rsqrt %122 : vector<16x1xf32>
    %124 = vector.broadcast %123 : vector<16x1xf32> to vector<16x32xf32>
    %125 = arith.mulf %120, %124 : vector<16x32xf32>
    %126 = vector.broadcast %13 : vector<1x32xf32> to vector<16x32xf32>
    %127 = arith.mulf %125, %126 : vector<16x32xf32>
    %128 = vector.broadcast %14 : vector<1x32xf32> to vector<16x32xf32>
    %129 = arith.addf %127, %128 : vector<16x32xf32>
    %cst_43 = arith.constant dense<0.000000e+00> : vector<16x64xf32>
    %130 = tpu.matmul %129, %4, %cst_43 {dimension_numbers = #tpu.dot_dimension_numbers<[1], [0], [0], [1], [0, 0, 1, 1], [], []>} : vector<16x32xf32>, vector<32x64xf32>, vector<16x64xf32> -> vector<16x64xf32>
    %131 = vector.broadcast %9 : vector<1x64xf32> to vector<16x64xf32>
    %132 = arith.addf %130, %131 : vector<16x64xf32>
    %cst_44 = arith.constant 5.000000e-01 : f32
    %133 = vector.broadcast %cst_44 : f32 to vector<16x64xf32>
    %134 = arith.mulf %133, %132 : vector<16x64xf32>
    %cst_45 = arith.constant 0.707106769 : f32
    %135 = vector.broadcast %cst_45 : f32 to vector<16x64xf32>
    %136 = arith.mulf %132, %135 : vector<16x64xf32>
    %137 = math.erf %136 : vector<16x64xf32>
    %cst_46 = arith.constant 1.000000e+00 : f32
    %138 = vector.broadcast %cst_46 : f32 to vector<16x64xf32>
    %139 = arith.addf %138, %137 : vector<16x64xf32>
    %140 = arith.mulf %134, %139 : vector<16x64xf32>
    %cst_47 = arith.constant dense<0.000000e+00> : vector<16x32xf32>
    %141 = tpu.matmul %140, %5, %cst_47 {dimension_numbers = #tpu.dot_dimension_numbers<[1], [0], [0], [1], [0, 0, 1, 1], [], []>} : vector<16x64xf32>, vector<64x32xf32>, vector<16x32xf32> -> vector<16x32xf32>
    %142 = vector.broadcast %10 : vector<1x32xf32> to vector<16x32xf32>
    %143 = arith.addf %141, %142 : vector<16x32xf32>
    %144 = arith.addf %107, %143 : vector<16x32xf32>
    %c0_48 = arith.constant 0 : index
    %c0_49 = arith.constant 0 : index
    %145 = vector.load %arg2[%c0_48, %c0_49] : memref<16x32xf32, #tpu.memory_space<vmem>>, vector<16x32xf32>
    tpu.vector_store %arg2[%c0_48, %c0_49], %144 {strides = array<i32>} : memref<16x32xf32, #tpu.memory_space<vmem>>, vector<16x32xf32>,
    return
  }
}

</mosaic_0001>

<bundles_post_ra>
// kernel: transformer_encoder_layer.1
= control target key start
LH: loop header
LB: loop body
LE: loop exit
PB: predicated region body
PF: predicated region fallthrough
CT: control target
= control target key end

     0   :  { %7 = vsyncpa [#allocation4], 0  ;;  %s2061_s0 = inlined_call_operand.hbm [shape: f32[16,32], index: 0, kind: input, shape index: {}]   ;;  %s2062_s1 = inlined_call_operand.hbm [shape: f32[344,128], index: 1, kind: input, shape index: {}]   ;;  %s2063_s2 = inlined_call_operand.hbm [shape: f32[16,32], index: 2, kind: output, shape index: {}]  }
   0x1   :  { %8 = vsyncpa [#allocation7], 0 }
   0x2   :  { %9 = vsyncpa [#allocation5], 0  ;;  %s1854_s9 = smov [#allocation3]  }
   0x3   :  { %s15_s10 = sshll.u32 %s1854_s9, 4  ;;  %s16_s10 = int_to_ptr.vmem [resolvable:$true] %s15_s10 }
   0x4   :  { %s1796_s11 = scalar_lea.vmem %s16_s10, 256  ;;  %p1801_p1 = scmp.lt.s32.totalorder %s16_s10, %s16_s10 }
   0x5   :  { %p1797_p0 = scmp.ne.s32.totalorder %s16_s10, %s1796_s11  ;;  %p1802_p2 = scmp.lt.s32.totalorder %s1796_s11, %s1796_s11 }
   0x7   :  { %p1803_p3 = por %p1802_p2, %p1801_p1 }
   0x9   :  { %p1804_p4 = pnand %p1803_p3, %p1797_p0 }
   0xb   :  { %1807 = shalt.err (!%p1804_p4)
}
   0xc   :  { %s1855_s12 = smov 128   ;;  %s1856_s13 = smov 8  }
   0xd   :  { %21 = dma.hbm_to_vmem [thread:$0]  %s2061_s0, 256, %s16_s10, [#allocation4], %s1855_s12, %s1855_s12, %s1856_s13  }
   0xe   :  { %s1857_s16 = smov [#allocation6]  }
   0xf   :  { %s27_s17 = sshll.u32 %s1857_s16, 4  ;;  %s28_s17 = int_to_ptr.vmem [resolvable:$true] %s27_s17 }
  0x10   :  { %s1816_s18 = scalar_lea.vmem %s28_s17, 5504  ;;  %p1821_p6 = scmp.lt.s32.totalorder %s28_s17, %s28_s17 }
  0x11   :  { %p1817_p5 = scmp.ne.s32.totalorder %s28_s17, %s1816_s18  ;;  %p1822_p7 = scmp.lt.s32.totalorder %s1816_s18, %s1816_s18 }
  0x13   :  { %p1823_p8 = por %p1822_p7, %p1821_p6 }
  0x15   :  { %p1824_p9 = pnand %p1823_p8, %p1817_p5 }
  0x17   :  { %1827 = shalt.err (!%p1824_p9)
}
  0x18   :  { %33 = dma.hbm_to_vmem [thread:$0]  %s2062_s1, 5504, %s28_s17, [#allocation7], %s1855_s12, %s1855_s12, %s1856_s13  }
  0x19   :  { %1848 = dma.done.wait [#allocation4], 256  }
  0x1a   :  { %1849 = vsyncadd [#allocation4], 4294967040 }
  0x1b   :  { %1850 = dma.done.wait [#allocation7], 5504  }
  0x1c   :  { %1851 = vsyncadd [#allocation7], 4294961792  ;;  %vm85_vm0 = vcmask 261120   ;;  %v1891_v0 = vld [vmem:[#allocation3 + $0x8] sm:$0xff]  ;;  %v1893_v1 = vld [vmem:[#allocation3] sm:$0xff]  ;;  %v117_v8 = vlaneseq  ;;  %s1858_s0 = smov 96  }
  0x1d   :  { %v89_v2 = vsel %vm85_vm0, %v1891_v0, 0.0  ;;  %v86_v3 = vsel %vm85_vm0, %v1893_v1, 0.0  ;;  %v96_v4 = vmul.f32 %v1891_v0, %v1891_v0  ;;  %v95_v5 = vmul.f32 %v1893_v1, %v1893_v1  ;;  %v1908_v11 = vld [vmem:[#allocation6 + $0x150] sm:$0xff]  ;;  %v42_v13 = vld [vmem:[#allocation6] sm:$0xff]  ;;  %v43_v39 = vld [vmem:[#allocation6 + $0x8] sm:$0xff]  ;;  %s1861_s1 = smov 64  }
  0x1e   :  { %90 = vadd.xlane.f32.xlu0 %v89_v2  ;;  %87 = vadd.xlane.f32.xlu1 %v86_v3  ;;  %v1905_v9 = vshrl.u32 %v117_v8, 7  ;;  %v44_v40 = vld [vmem:[#allocation6 + $0x10] sm:$0xff]  ;;  %v45_v41 = vld [vmem:[#allocation6 + $0x18] sm:$0xff]  ;;  %v46_v42 = vld [vmem:[#allocation6 + $0x20] sm:$0xff]  ;;  %vm328_vm1 = vcmask 64512   ;;  %vm410_vm2 = vcmask 130048  }
  0x1f   :  { %v100_v6 = vsel %vm85_vm0, %v96_v4, 0.0  ;;  %v97_v7 = vsel %vm85_vm0, %v95_v5, 0.0  ;;  %1627 = vmatprep.mubr.msk.f32.mxu0 %vm85_vm0, %v42_v13  ;;  %v47_v43 = vld [vmem:[#allocation6 + $0x28] sm:$0xff]  ;;  %v54_v45 = vld [vmem:[#allocation6 + $0x60] sm:$0xff]  ;;  %v48_v56 = vld [vmem:[#allocation6 + $0x30] sm:$0xff]  ;;  %vm1860_vm3 = vmmov 0  }
  0x20   :  { %v119_v10 = vsub.s32 1, %v1905_v9  ;;  %v58_v51 = vld [vmem:[#allocation6 + $0x80] sm:$0xff]  ;;  %v49_v57 = vld [vmem:[#allocation6 + $0x38] sm:$0xff]  ;;  %v51_v59 = vld [vmem:[#allocation6 + $0x48] sm:$0xff]  ;;  %s1862_s21 = smov 32   ;;  %vm1419_vm4 = vcmask 523264  }
  0x21   :  { %v50_v58 = vld [vmem:[#allocation6 + $0x40] sm:$0xff]  ;;  %v1941_v60 = vld [vmem:[#allocation6 + $0x148] sm:$0xff]  ;;  %s1863_s22 = smov [#allocation8]  }
  0x22   :  { %101 = vadd.xlane.f32.xlu0 %v100_v6  ;;  %98 = vadd.xlane.f32.xlu1 %v97_v7  ;;  %v1911_v12 = vrot.slane %v1908_v11, %v119_v10  ;;  %v1943_v62 = vld [vmem:[#allocation6 + $0x140] sm:$0xff]  ;;  %s1510_s23 = sshll.u32 %s1863_s22, 4  ;;  %s1511_s23 = int_to_ptr.vmem [resolvable:$true] %s1510_s23 }
  0x23   :  { %s1828_s24 = scalar_lea.vmem %s1511_s23, 256  ;;  %p1833_p11 = scmp.lt.s32.totalorder %s1511_s23, %s1511_s23 }
  0x24   :  { %p1829_p10 = scmp.ne.s32.totalorder %s1511_s23, %s1828_s24  ;;  %p1834_p12 = scmp.lt.s32.totalorder %s1828_s24, %s1828_s24 }
  0x26   :  { %p1835_p13 = por %p1834_p12, %p1833_p11 }
  0x28   :  { %p1836_p0 = pnand %p1835_p13, %p1829_p10 }
  0x38   :  { %124 = vrot.lane.b32.xlu0 %v1911_v12, %s1858_s0 }
  0xa7   :  { %v91_v14 = vpop.xlane.xlu0 %90  ;;  %v88_v15 = vpop.xlane.xlu1 %87 }
  0xa8   :  { %v94_v16 = vmul.f32 0.03125, %v91_v14  ;;  %v93_v17 = vmul.f32 0.03125, %v88_v15 }
  0xaa   :  { %v105_v18 = vmul.f32 %v93_v17, %v93_v17  ;;  %v106_v21 = vmul.f32 %v94_v16, %v94_v16  ;;  %v110_v28 = vsub.f32 %v1891_v0, %v94_v16  ;;  %v109_v30 = vsub.f32 %v1893_v1, %v93_v17 }
  0xab   :  { %v102_v19 = vpop.xlane.xlu0 %101  ;;  %v99_v20 = vpop.xlane.xlu1 %98 }
  0xac   :  { %v104_v22 = vmul.f32 0.03125, %v102_v19  ;;  %v103_v23 = vmul.f32 0.03125, %v99_v20  ;;  %v1859_v19 = vmov 0.0   ;;  %v55_v20 = vld [vmem:[#allocation6 + $0x68] sm:$0xff] }
  0xae   :  { %v108_v24 = vsub.f32 %v104_v22, %v106_v21  ;;  %v107_v25 = vsub.f32 %v103_v23, %v105_v18 }
  0xaf   :  { %v125_v33 = vpop.permute.xlu0 %124 }
  0xb0   :  { %v112_v26 = vadd.f32 1e-05, %v108_v24  ;;  %v111_v27 = vadd.f32 1e-05, %v107_v25 }
  0xb2   :  { %1744 = vrsqrt.f32 %v112_v26 }
  0xb3   :  { %1746 = vrsqrt.f32 %v111_v27 }
  0xbf   :  { %v1745_v29 = vpop.eup %1744 }
  0xc0   :  { %v1747_v31 = vpop.eup %1746  ;;  %v116_v32 = vmul.f32 %v1745_v29, %v110_v28  ;;  %v59_v29 = vld [vmem:[#allocation6 + $0x88] sm:$0xff] }
  0xc1   :  { %v115_v34 = vmul.f32 %v1747_v31, %v109_v30  ;;  %v62_v31 = vld [vmem:[#allocation6 + $0xa0] sm:$0xff] }
  0xc2   :  { %v122_v35 = vmul.f32 %v1911_v12, %v116_v32 }
  0xc3   :  { %v121_v36 = vmul.f32 %v1911_v12, %v115_v34 }
  0xc4   :  { %v128_v37 = vadd.f32 %v125_v33, %v122_v35 }
  0xc5   :  { %v127_v38 = vadd.f32 %v125_v33, %v121_v36 }
  0xc6   :  { %1623 = vmatprep.subr.msk.mxu0 %vm85_vm0, %v128_v37 }
  0xc7   :  { %1624 = vmatpush3.xpose.msk.msra.mxu0 %vm85_vm0, %v128_v37 }
  0xc8   :  { %1625 = vmatprep.subr.msk.mxu0 %vm85_vm0, %v127_v38 }
  0xcb   :  { %1626 = vmatpush3.xpose.msk.msra.mxu0 %vm85_vm0, %v127_v38 }
  0xce   :  { %1628 = vmatmul.mubr.msk.f32.vlgmr.msra.gmra.mxu0 %vm85_vm0, %v43_v39 }
  0xcf   :  { %1630 = vmatprep.mubr.msk.f32.mxu0 %vm85_vm0, %v44_v40 }
  0xd2   :  { %1631 = vmatmul.mubr.msk.f32.gmra.mxu0 %vm85_vm0, %v45_v41 }
  0xd3   :  { %1633 = vmatprep.mubr.msk.f32.mxu0 %vm85_vm0, %v46_v42 }
  0xd6   :  { %1634 = vmatmul.mubr.msk.f32.gmra.mxu0 %vm85_vm0, %v47_v43 }
  0xd7   :  { %1636 = vmatprep.mubr.msk.f32.mxu0 %vm85_vm0, %v48_v56 }
  0xda   :  { %1637 = vmatmul.mubr.msk.f32.gmra.mxu0 %vm85_vm0, %v49_v57 }
  0xdb   :  { %1639 = vmatprep.mubr.msk.f32.mxu0 %vm85_vm0, %v50_v58  ;;  %v56_v58 = vld [vmem:[#allocation6 + $0x70] sm:$0xff] }
  0xde   :  { %1640 = vmatmul.mubr.msk.f32.gmra.mxu0 %vm85_vm0, %v51_v59 }
 0x18e   :  { %v1629_v44 = vpop.f32.mrf.mxu0 }
 0x18f   :  { %v243_v21 = vadd.f32 %v1629_v44, %v55_v20 }
 0x190   :  { %v237_v46 = vpop.f32.mrf.mxu0 }
 0x191   :  { %v238_v47 = vadd.f32 %v237_v46, %v54_v45 }
 0x192   :  { %v1929_v48 = vpop.f32.mrf.mxu0 }
 0x193   :  { %296 = vxpose.xlu1.b32.start.end [1/1] (short) (narrow) %v238_v47, 16 }
 0x194   :  { %v1931_v49 = vpop.f32.mrf.mxu0 }
 0x195   :  { %v248_v59 = vadd.f32 %v1931_v49, %v56_v58 }
 0x196   :  { %v1933_v50 = vpop.f32.mrf.mxu0 }
 0x197   :  { %v263_v34 = vadd.f32 %v1933_v50, %v59_v29 }
 0x198   :  { %v257_v52 = vpop.f32.mrf.mxu0 }
 0x199   :  { %v258_v53 = vadd.f32 %v257_v52, %v58_v51 }
 0x19a   :  { %v1954_v24 = vpop.f32.mrf.mxu0 }
 0x19b   :  { %1645 = vmatprep.subr.mxu1 %v258_v53 }
 0x19c   :  { %1646 = vmatpush3.msra.mxu1 %v258_v53  ;;  %v1956_v25 = vpop.f32.mrf.mxu0 }
 0x19d   :  { %1650 = vmatprep.subr.mxu1 %v1859_v19 }
 0x19e   :  { %v1958_v26 = vpop.f32.mrf.mxu0 }
 0x1a0   :  { %v277_v30 = vpop.f32.mrf.mxu0 }
 0x1a1   :  { %v278_v35 = vadd.f32 %v277_v30, %v62_v31 }
 0x20f   :  { %v312_v54 = vpop.trf.xlu1 }
 0x210   :  { %1647 = vmatprep.mubr.msk.f32.mxu1 %vm328_vm1, %v312_v54 }
 0x213   :  { %v313_v55 = vpop.trf.xlu1 }
 0x214   :  { %1648 = vmatmul.mubr.msk.f32.vlgmr.msra.gmra.mxu1 %vm328_vm1, %v313_v55 }
 0x215   :  { %1654 = vmatprep.mubr.msk.f32.mxu1 %vm1860_vm3, %v1859_v19 }
 0x2d4   :  { %v1649_v61 = vpop.f32.mrf.mxu1 }
 0x2d5   :  { %v407_v63 = vadd.f32 %v1649_v61, %v1941_v60 }
 0x2d6   :  { %v401_v2 = vpop.f32.mrf.mxu1 }
 0x2d7   :  { %v402_v3 = vadd.f32 %v401_v2, %v1943_v62  ;;  %v414_v4 = vsel %vm410_vm2, %v407_v63, -inf }
 0x2d8   :  { %415 = vmax.xlane.f32.xlu0 %v414_v4  ;;  %v60_v4 = vld [vmem:[#allocation6 + $0x90] sm:$0xff] }
 0x2d9   :  { %v411_v5 = vsel %vm410_vm2, %v402_v3, -inf }
 0x2da   :  { %412 = vmax.xlane.f32.xlu1 %v411_v5 }
 0x361   :  { %v416_v6 = vpop.xlane.xlu0 %415 }
 0x362   :  { %v418_v7 = vsub.f32 %v407_v63, %v416_v6  ;;  %v63_v6 = vld [vmem:[#allocation6 + $0xa8] sm:$0xff] }
 0x363   :  { %v413_v8 = vpop.xlane.xlu1 %412  ;;  %v283_v49 = vadd.f32 %v1958_v26, %v63_v6 }
 0x364   :  { %v421_v10 = vmul.f32 1.442695, %v418_v7  ;;  %v417_v13 = vsub.f32 %v402_v3, %v413_v8  ;;  %v268_v8 = vadd.f32 %v1956_v25, %v60_v4 }
 0x366   :  { %1748 = vpow2.f32 %v421_v10  ;;  %v419_v14 = vmul.f32 1.442695, %v417_v13 }
 0x368   :  { %1750 = vpow2.f32 %v419_v14  ;;  %v52_v14 = vld [vmem:[#allocation6 + $0x50] sm:$0xff] }
 0x369   :  { %1642 = vmatprep.mubr.msk.f32.mxu0 %vm85_vm0, %v52_v14 }
 0x373   :  { %v1749_v15 = vpop.eup %1748 }
 0x374   :  { %v426_v16 = vsel %vm410_vm2, %v1749_v15, 0.0 }
 0x375   :  { %v1751_v17 = vpop.eup %1750  ;;  %427 = vadd.xlane.f32.xlu0 %v426_v16 }
 0x376   :  { %v423_v18 = vsel %vm410_vm2, %v1751_v17, 0.0 }
 0x379   :  { %424 = vadd.xlane.f32.xlu0 %v423_v18 }
 0x3a6   :  { %513 = vxpose.xlu0.b32.start.end [1/1] (short) (narrow) %v243_v21, 16 }
 0x3fe   :  { %v428_v22 = vpop.xlane.xlu0 %427 }
 0x3ff   :  { %1752 = vrcp.f32 %v428_v22 }
 0x402   :  { %v425_v23 = vpop.xlane.xlu0 %424 }
 0x403   :  { %1754 = vrcp.f32 %v425_v23 }
 0x40c   :  { %v1753_v27 = vpop.eup %1752 }
 0x40d   :  { %v432_v28 = vmul.f32 %v1753_v27, %v1749_v15  ;;  %v53_v15 = vld [vmem:[#allocation6 + $0x58] sm:$0xff] }
 0x40e   :  { %1643 = vmatmul.mubr.msk.f32.gmra.mxu0 %vm85_vm0, %v53_v15 }
 0x40f   :  { %1651 = vmatpush3.xpose.msk.msra.mxu1 %vm410_vm2, %v432_v28 }
 0x410   :  { %v1755_v32 = vpop.eup %1754  ;;  %1652 = vmatprep.subr.mxu1 %v1859_v19 }
 0x411   :  { %v430_v33 = vmul.f32 %v1755_v32, %v1751_v17 }
 0x413   :  { %1653 = vmatpush3.xpose.msk.msra.mxu1 %vm410_vm2, %v430_v33 }
 0x414   :  { %1657 = vmatprep.subr.mxu1 %v263_v34 }
 0x416   :  { %1655 = vmatmul.mubr.msk.f32.vlgmr.msra.gmra.mxu1 %vm410_vm2, %v278_v35 }
 0x417   :  { %1658 = vmatpush3.msra.mxu1 %v263_v34 }
 0x418   :  { %1662 = vmatprep.subr.mxu1 %v1859_v19 }
 0x422   :  { %v529_v36 = vpop.trf.xlu0 }
 0x423   :  { %1659 = vmatprep.mubr.msk.f32.mxu1 %vm328_vm1, %v529_v36  ;;  %v57_v36 = vld [vmem:[#allocation6 + $0x78] sm:$0xff] }
 0x426   :  { %v530_v37 = vpop.trf.xlu0 }
 0x427   :  { %1660 = vmatmul.mubr.msk.f32.vlgmr.msra.gmra.mxu1 %vm328_vm1, %v530_v37  ;;  %v253_v37 = vadd.f32 %v1929_v48, %v57_v36 }
 0x428   :  { %1666 = vmatprep.mubr.msk.f32.mxu1 %vm1860_vm3, %v1859_v19 }
 0x4d6   :  { %v508_v38 = vpop.f32.mrf.mxu1 }
 0x4d7   :  { %512 = vst.msk [vmem:[#allocation2] sm:$0xff] %vm410_vm2, %v508_v38 }
 0x4d8   :  { %v1656_v39 = vpop.f32.mrf.mxu1 }
 0x4e7   :  { %v1661_v40 = vpop.f32.mrf.mxu1 }
 0x4e8   :  { %v623_v41 = vadd.f32 %v1661_v40, %v1941_v60  ;;  %v1999_v40 = vpop.f32.mrf.mxu0 }
 0x4e9   :  { %v617_v42 = vpop.f32.mrf.mxu1 }
 0x4ea   :  { %v618_v43 = vadd.f32 %v617_v42, %v1943_v62  ;;  %v629_v44 = vsel %vm410_vm2, %v623_v41, -inf }
 0x4eb   :  { %630 = vmax.xlane.f32.xlu1 %v629_v44  ;;  %v287_v44 = vpop.f32.mrf.mxu0 }
 0x4ec   :  { %v626_v45 = vsel %vm410_vm2, %v618_v43, -inf }
 0x4ef   :  { %627 = vmax.xlane.f32.xlu1 %v626_v45  ;;  %v64_v45 = vld [vmem:[#allocation6 + $0xb0] sm:$0xff] }
 0x574   :  { %v631_v46 = vpop.xlane.xlu1 %630 }
 0x575   :  { %v633_v47 = vsub.f32 %v623_v41, %v631_v46 }
 0x577   :  { %v636_v50 = vmul.f32 1.442695, %v633_v47 }
 0x578   :  { %v628_v51 = vpop.xlane.xlu1 %627 }
 0x579   :  { %1756 = vpow2.f32 %v636_v50  ;;  %v632_v52 = vsub.f32 %v618_v43, %v628_v51  ;;  %v61_v43 = vld [vmem:[#allocation6 + $0x98] sm:$0xff]  ;;  %v288_v50 = vadd.f32 %v287_v44, %v64_v45  ;;  %v70_v44 = vld [vmem:[#allocation6 + $0xe0] sm:$0xff] }
 0x57a   :  { %v273_v48 = vadd.f32 %v1954_v24, %v61_v43  ;;  %v71_v43 = vld [vmem:[#allocation6 + $0xe8] sm:$0xff] }
 0x57b   :  { %v634_v53 = vmul.f32 1.442695, %v632_v52 }
 0x57d   :  { %1758 = vpow2.f32 %v634_v53 }
 0x586   :  { %v1757_v54 = vpop.eup %1756 }
 0x587   :  { %v641_v55 = vsel %vm410_vm2, %v1757_v54, 0.0 }
 0x588   :  { %642 = vadd.xlane.f32.xlu1 %v641_v55 }
 0x58a   :  { %v1759_v56 = vpop.eup %1758 }
 0x58b   :  { %v638_v57 = vsel %vm410_vm2, %v1759_v56, 0.0 }
 0x58c   :  { %639 = vadd.xlane.f32.xlu0 %v638_v57 }
 0x5bb   :  { %728 = vxpose.xlu1.b32.start.end [1/1] (short) (narrow) %v248_v59, 16 }
 0x611   :  { %v643_v61 = vpop.xlane.xlu1 %642 }
 0x612   :  { %1760 = vrcp.f32 %v643_v61 }
 0x615   :  { %v640_v63 = vpop.xlane.xlu0 %639 }
 0x616   :  { %1762 = vrcp.f32 %v640_v63 }
 0x61f   :  { %v1761_v2 = vpop.eup %1760 }
 0x620   :  { %v647_v3 = vmul.f32 %v1761_v2, %v1757_v54 }
 0x622   :  { %1663 = vmatpush3.xpose.msk.msra.mxu1 %vm410_vm2, %v647_v3 }
 0x623   :  { %v1763_v5 = vpop.eup %1762  ;;  %1664 = vmatprep.subr.mxu1 %v1859_v19 }
 0x624   :  { %v645_v7 = vmul.f32 %v1763_v5, %v1759_v56 }
 0x626   :  { %1665 = vmatpush3.xpose.msk.msra.mxu1 %vm410_vm2, %v645_v7 }
 0x627   :  { %1669 = vmatprep.subr.mxu1 %v268_v8 }
 0x629   :  { %1667 = vmatmul.mubr.msk.f32.vlgmr.msra.gmra.mxu1 %vm410_vm2, %v283_v49 }
 0x62a   :  { %1670 = vmatpush3.msra.mxu1 %v268_v8  ;;  %v1158_v8 = vld [vmem:[#allocation2] sm:$0xff] }
 0x62b   :  { %1674 = vmatprep.subr.mxu1 %v1859_v19 }
 0x637   :  { %v744_v10 = vpop.trf.xlu1 }
 0x638   :  { %1671 = vmatprep.mubr.msk.f32.mxu1 %vm328_vm1, %v744_v10 }
 0x63b   :  { %v745_v13 = vpop.trf.xlu1 }
 0x63c   :  { %1672 = vmatmul.mubr.msk.f32.vlgmr.msra.gmra.mxu1 %vm328_vm1, %v745_v13 }
 0x63d   :  { %1678 = vmatprep.mubr.msk.f32.mxu1 %vm1860_vm3, %v1859_v19 }
 0x6e9   :  { %v723_v16 = vpop.f32.mrf.mxu1 }
 0x6ea   :  { %727 = vst.msk [vmem:[#allocation2 + $0x8] sm:$0xff] %vm410_vm2, %v723_v16 }
 0x6eb   :  { %v1668_v17 = vpop.f32.mrf.mxu1 }
 0x6f1   :  { %v1159_v49 = vld [vmem:[#allocation2 + $0x8] sm:$0xff] }
 0x6fc   :  { %v1673_v18 = vpop.f32.mrf.mxu1 }
 0x6fd   :  { %v838_v20 = vadd.f32 %v1673_v18, %v1941_v60  ;;  %v65_v18 = vld [vmem:[#allocation6 + $0xb8] sm:$0xff] }
 0x6fe   :  { %v832_v21 = vpop.f32.mrf.mxu1 }
 0x6ff   :  { %v833_v22 = vadd.f32 %v832_v21, %v1943_v62  ;;  %v844_v23 = vsel %vm410_vm2, %v838_v20, -inf  ;;  %v293_v21 = vadd.f32 %v1999_v40, %v65_v18 }
 0x700   :  { %845 = vmax.xlane.f32.xlu0 %v844_v23  ;;  %v68_v23 = vld [vmem:[#allocation6 + $0xd0] sm:$0xff] }
 0x701   :  { %v841_v25 = vsel %vm410_vm2, %v833_v22, -inf }
 0x702   :  { %842 = vmax.xlane.f32.xlu1 %v841_v25  ;;  %v67_v25 = vld [vmem:[#allocation6 + $0xc8] sm:$0xff] }
 0x789   :  { %v846_v26 = vpop.xlane.xlu0 %845 }
 0x78a   :  { %v848_v27 = vsub.f32 %v838_v20, %v846_v26  ;;  %v66_v26 = vld [vmem:[#allocation6 + $0xc0] sm:$0xff] }
 0x78b   :  { %v843_v28 = vpop.xlane.xlu1 %842 }
 0x78c   :  { %v851_v29 = vmul.f32 1.442695, %v848_v27  ;;  %v847_v30 = vsub.f32 %v833_v22, %v843_v28  ;;  %v69_v22 = vld [vmem:[#allocation6 + $0xd8] sm:$0xff] }
 0x78d   :  { %1693 = vmatprep.subr.mxu0 %v69_v22 }
 0x78e   :  { %1764 = vpow2.f32 %v851_v29  ;;  %v849_v31 = vmul.f32 1.442695, %v847_v30  ;;  %1694 = vmatpush3.msra.mxu0 %v69_v22 }
 0x78f   :  { %1695 = vmatprep.subr.mxu0 %v68_v23 }
 0x790   :  { %1766 = vpow2.f32 %v849_v31  ;;  %1696 = vmatpush3.msra.mxu0 %v68_v23  ;;  %v1164_v31 = vsub.s32 0, %v1905_v9 }
 0x791   :  { %1697 = vmatprep.subr.mxu0 %v67_v25 }
 0x792   :  { %1698 = vmatpush3.msra.mxu0 %v67_v25 }
 0x793   :  { %1699 = vmatprep.subr.mxu0 %v66_v26 }
 0x794   :  { %1700 = vmatpush3.msra.mxu0 %v66_v26 }
 0x79b   :  { %v1765_v32 = vpop.eup %1764 }
 0x79c   :  { %v856_v33 = vsel %vm410_vm2, %v1765_v32, 0.0 }
 0x79d   :  { %v1767_v34 = vpop.eup %1766  ;;  %857 = vadd.xlane.f32.xlu0 %v856_v33 }
 0x79e   :  { %v853_v35 = vsel %vm410_vm2, %v1767_v34, 0.0 }
 0x7a1   :  { %854 = vadd.xlane.f32.xlu0 %v853_v35 }
 0x7ce   :  { %943 = vxpose.xlu0.b32.start.end [1/1] (short) (narrow) %v253_v37, 16 }
 0x826   :  { %v858_v38 = vpop.xlane.xlu0 %857 }
 0x827   :  { %1768 = vrcp.f32 %v858_v38 }
 0x82a   :  { %v855_v39 = vpop.xlane.xlu0 %854 }
 0x82b   :  { %1770 = vrcp.f32 %v855_v39 }
 0x834   :  { %v1769_v41 = vpop.eup %1768 }
 0x835   :  { %v862_v42 = vmul.f32 %v1769_v41, %v1765_v32  ;;  %v1165_v32 = vrot.slane %v1908_v11, %v1164_v31  ;;  %v73_v41 = vld [vmem:[#allocation6 + $0xf8] sm:$0xff] }
 0x837   :  { %1675 = vmatpush3.xpose.msk.msra.mxu1 %vm410_vm2, %v862_v42  ;;  %v72_v42 = vld [vmem:[#allocation6 + $0xf0] sm:$0xff] }
 0x838   :  { %v1771_v46 = vpop.eup %1770  ;;  %1676 = vmatprep.subr.mxu1 %v1859_v19 }
 0x839   :  { %v860_v47 = vmul.f32 %v1771_v46, %v1767_v34 }
 0x83b   :  { %1677 = vmatpush3.xpose.msk.msra.mxu1 %vm410_vm2, %v860_v47 }
 0x83c   :  { %1681 = vmatprep.subr.mxu1 %v273_v48 }
 0x83e   :  { %1679 = vmatmul.mubr.msk.f32.vlgmr.msra.gmra.mxu1 %vm410_vm2, %v288_v50 }
 0x83f   :  { %1682 = vmatpush3.msra.mxu1 %v273_v48 }
 0x840   :  { %1686 = vmatprep.subr.mxu1 %v1859_v19 }
 0x84a   :  { %v959_v51 = vpop.trf.xlu0 }
 0x84b   :  { %1683 = vmatprep.mubr.msk.f32.mxu1 %vm328_vm1, %v959_v51 }
 0x84e   :  { %v960_v52 = vpop.trf.xlu0 }
 0x84f   :  { %1684 = vmatmul.mubr.msk.f32.vlgmr.msra.gmra.mxu1 %vm328_vm1, %v960_v52 }
 0x850   :  { %1690 = vmatprep.mubr.msk.f32.mxu1 %vm1860_vm3, %v1859_v19 }
 0x8fe   :  { %v938_v53 = vpop.f32.mrf.mxu1 }
 0x8ff   :  { %942 = vst.msk [vmem:[#allocation2 + $0x10] sm:$0xff] %vm410_vm2, %v938_v53 }
 0x900   :  { %v1680_v24 = vpop.f32.mrf.mxu1 }
 0x906   :  { %v1160_v10 = vld [vmem:[#allocation2 + $0x10] sm:$0xff] }
 0x90f   :  { %v1685_v54 = vpop.f32.mrf.mxu1 }
 0x910   :  { %v1053_v55 = vadd.f32 %v1685_v54, %v1941_v60 }
 0x911   :  { %v1047_v56 = vpop.f32.mrf.mxu1 }
 0x912   :  { %v1048_v57 = vadd.f32 %v1047_v56, %v1943_v62  ;;  %v1059_v58 = vsel %vm410_vm2, %v1053_v55, -inf }
 0x913   :  { %1060 = vmax.xlane.f32.xlu1 %v1059_v58 }
 0x914   :  { %v1056_v59 = vsel %vm410_vm2, %v1048_v57, -inf }
 0x917   :  { %1057 = vmax.xlane.f32.xlu1 %v1056_v59 }
 0x99c   :  { %v1061_v61 = vpop.xlane.xlu1 %1060 }
 0x99d   :  { %v1063_v63 = vsub.f32 %v1053_v55, %v1061_v61 }
 0x99f   :  { %v1066_v2 = vmul.f32 1.442695, %v1063_v63 }
 0x9a0   :  { %v1058_v3 = vpop.xlane.xlu1 %1057 }
 0x9a1   :  { %1772 = vpow2.f32 %v1066_v2  ;;  %v1062_v4 = vsub.f32 %v1048_v57, %v1058_v3 }
 0x9a3   :  { %v1064_v5 = vmul.f32 1.442695, %v1062_v4 }
 0x9a5   :  { %1774 = vpow2.f32 %v1064_v5 }
 0x9ae   :  { %v1773_v6 = vpop.eup %1772 }
 0x9af   :  { %v1071_v60 = vsel %vm410_vm2, %v1773_v6, 0.0 }
 0x9b0   :  { %1072 = vadd.xlane.f32.xlu1 %v1071_v60 }
 0x9b2   :  { %v1775_v7 = vpop.eup %1774 }
 0x9b3   :  { %v1068_v62 = vsel %vm410_vm2, %v1775_v7, 0.0 }
 0x9b4   :  { %1069 = vadd.xlane.f32.xlu0 %v1068_v62 }
 0x9e3   :  { %1166 = vxpose.xlu1.b32.start [1/4] (short) (narrow) %v1158_v8, 16  ;;  %v81_v8 = vld [vmem:[#allocation6 + $0x138] sm:$0xff] }
 0x9e4   :  { %1715 = vmatprep.subr.mxu0 %v81_v8 }
 0x9e7   :  { %1167 = vxpose.xlu1.b32.cont [2/4] (short) (narrow) %v1159_v49, 16  ;;  %v80_v49 = vld [vmem:[#allocation6 + $0x130] sm:$0xff] }
 0x9eb   :  { %1168 = vxpose.xlu1.b32.cont [3/4] (short) (narrow) %v1160_v10, 16  ;;  %v79_v10 = vld [vmem:[#allocation6 + $0x128] sm:$0xff] }
 0xa39   :  { %v1073_v13 = vpop.xlane.xlu1 %1072 }
 0xa3a   :  { %1776 = vrcp.f32 %v1073_v13  ;;  %v78_v13 = vld [vmem:[#allocation6 + $0x120] sm:$0xff] }
 0xa3d   :  { %v1070_v14 = vpop.xlane.xlu0 %1069 }
 0xa3e   :  { %1778 = vrcp.f32 %v1070_v14  ;;  %v77_v14 = vld [vmem:[#allocation6 + $0x118] sm:$0xff] }
 0xa47   :  { %v1777_v15 = vpop.eup %1776 }
 0xa48   :  { %v1077_v16 = vmul.f32 %v1777_v15, %v1773_v6  ;;  %v76_v15 = vld [vmem:[#allocation6 + $0x110] sm:$0xff] }
 0xa4a   :  { %1687 = vmatpush3.xpose.msk.msra.mxu1 %vm410_vm2, %v1077_v16  ;;  %v75_v16 = vld [vmem:[#allocation6 + $0x108] sm:$0xff] }
 0xa4b   :  { %v1779_v17 = vpop.eup %1778  ;;  %1688 = vmatprep.subr.mxu1 %v1859_v19 }
 0xa4c   :  { %v1075_v20 = vmul.f32 %v1779_v17, %v1775_v7  ;;  %v74_v17 = vld [vmem:[#allocation6 + $0x100] sm:$0xff] }
 0xa4e   :  { %1689 = vmatpush3.xpose.msk.msra.mxu1 %vm410_vm2, %v1075_v20 }
 0xa4f   :  { %1704 = vmatprep.subr.mxu1 %v73_v41 }
 0xa51   :  { %1691 = vmatmul.mubr.msk.f32.vlgmr.msra.gmra.mxu1 %vm410_vm2, %v293_v21 }
 0xa52   :  { %1705 = vmatpush3.msra.mxu1 %v73_v41 }
 0xa53   :  { %1706 = vmatprep.subr.mxu1 %v72_v42 }
 0xa54   :  { %1707 = vmatpush3.msra.mxu1 %v72_v42 }
 0xa55   :  { %1708 = vmatprep.subr.mxu1 %v71_v43 }
 0xa56   :  { %1709 = vmatpush3.msra.mxu1 %v71_v43 }
 0xa57   :  { %1710 = vmatprep.subr.mxu1 %v70_v44 }
 0xa58   :  { %1711 = vmatpush3.msra.mxu1 %v70_v44 }
 0xb11   :  { %v1153_v19 = vpop.f32.mrf.mxu1 }
 0xb12   :  { %1157 = vst.msk [vmem:[#allocation2 + $0x18] sm:$0xff] %vm410_vm2, %v1153_v19 }
 0xb13   :  { %v1692_v27 = vpop.f32.mrf.mxu1 }
 0xb19   :  { %v1161_v28 = vld [vmem:[#allocation2 + $0x18] sm:$0xff] }
 0xb1a   :  { %1169 = vxpose.xlu1.b32.end [4/4] (short) (narrow) %v1161_v28, 16 }
 0xb38   :  { %1311 = vrot.lane.b32.xlu1 %v1911_v12, %s1861_s1 }
 0xb8a   :  { %v1182_v29 = vpop.trf.xlu1 }
 0xb8b   :  { %1701 = vmatprep.mubr.msk.f32.mxu0 %vm85_vm0, %v1182_v29 }
 0xb8e   :  { %v1183_v30 = vpop.trf.xlu1 }
 0xb8f   :  { %1702 = vmatmul.mubr.msk.f32.vlgmr.msra.gmra.mxu0 %vm85_vm0, %v1183_v30 }
 0xb90   :  { %1716 = vmatpush3.msra.mxu0 %v81_v8 }
 0xb91   :  { %1717 = vmatprep.subr.mxu0 %v80_v49 }
 0xb92   :  { %1718 = vmatpush3.msra.mxu0 %v80_v49 }
 0xb93   :  { %1719 = vmatprep.subr.mxu0 %v79_v10 }
 0xb94   :  { %1720 = vmatpush3.msra.mxu0 %v79_v10 }
 0xb95   :  { %1721 = vmatprep.subr.mxu0 %v78_v13 }
 0xb96   :  { %1722 = vmatpush3.msra.mxu0 %v78_v13 }
 0xb97   :  { %1723 = vmatprep.subr.mxu0 %v77_v14 }
 0xb98   :  { %1724 = vmatpush3.msra.mxu0 %v77_v14 }
 0xb99   :  { %1725 = vmatprep.subr.mxu0 %v76_v15 }
 0xb9a   :  { %1726 = vmatpush3.msra.mxu0 %v76_v15 }
 0xb9b   :  { %1727 = vmatprep.subr.mxu0 %v75_v16 }
 0xb9c   :  { %1728 = vmatpush3.msra.mxu0 %v75_v16 }
 0xb9d   :  { %1729 = vmatprep.subr.mxu0 %v74_v17 }
 0xb9e   :  { %1730 = vmatpush3.msra.mxu0 %v74_v17 }
 0xbaa   :  { %v1312_v61 = vpop.permute.xlu1 %1311 }
 0xc4f   :  { %v1703_v33 = vpop.f32.mrf.mxu0 }
 0xc50   :  { %v1276_v34 = vadd.f32 %v1703_v33, %v1165_v32 }
 0xc51   :  { %v1270_v35 = vpop.f32.mrf.mxu0 }
 0xc52   :  { %v2030_v36 = vadd.f32 %v1276_v34, %v1891_v0  ;;  %v1271_v37 = vadd.f32 %v1270_v35, %v1165_v32 }
 0xc54   :  { %v2033_v38 = vadd.f32 %v1271_v37, %v1893_v1  ;;  %v1284_v39 = vsel %vm85_vm0, %v2030_v36, 0.0  ;;  %v1290_v0 = vmul.f32 %v2030_v36, %v2030_v36 }
 0xc55   :  { %1285 = vadd.xlane.f32.xlu0 %v1284_v39 }
 0xc56   :  { %v1281_v40 = vsel %vm85_vm0, %v2033_v38, 0.0  ;;  %v1289_v9 = vmul.f32 %v2033_v38, %v2033_v38  ;;  %v1294_v1 = vsel %vm85_vm0, %v1290_v0, 0.0 }
 0xc58   :  { %v1291_v11 = vsel %vm85_vm0, %v1289_v9, 0.0 }
 0xc59   :  { %1282 = vadd.xlane.f32.xlu0 %v1281_v40 }
 0xc5d   :  { %1292 = vadd.xlane.f32.xlu0 %v1291_v11 }
 0xc61   :  { %1295 = vadd.xlane.f32.xlu0 %v1294_v1 }
 0xc77   :  { %1316 = vrot.lane.b32.xlu0 %v1911_v12, %s1862_s21 }
 0xc7b   :  { %1322 = vrot.lane.b32.xlu0 %v1165_v32, %s1858_s0 }
 0xc7f   :  { %1416 = vrot.lane.b32.xlu0 %v1165_v32, %s1862_s21 }
 0xcde   :  { %v1286_v45 = vpop.xlane.xlu0 %1285 }
 0xcdf   :  { %v1288_v12 = vmul.f32 0.03125, %v1286_v45 }
 0xce1   :  { %v1300_v24 = vmul.f32 %v1288_v12, %v1288_v12  ;;  %v1304_v3 = vsub.f32 %v2030_v36, %v1288_v12 }
 0xce2   :  { %v1283_v46 = vpop.xlane.xlu0 %1282 }
 0xce3   :  { %v1287_v47 = vmul.f32 0.03125, %v1283_v46 }
 0xce5   :  { %v1299_v50 = vmul.f32 %v1287_v47, %v1287_v47  ;;  %v1303_v58 = vsub.f32 %v2033_v38, %v1287_v47 }
 0xce6   :  { %v1293_v48 = vpop.xlane.xlu0 %1292 }
 0xce7   :  { %v1297_v51 = vmul.f32 0.03125, %v1293_v48 }
 0xce9   :  { %v1301_v52 = vsub.f32 %v1297_v51, %v1299_v50 }
 0xcea   :  { %v1296_v53 = vpop.xlane.xlu0 %1295 }
 0xceb   :  { %v1305_v54 = vadd.f32 1e-05, %v1301_v52  ;;  %v1298_v55 = vmul.f32 0.03125, %v1296_v53 }
 0xced   :  { %1780 = vrsqrt.f32 %v1305_v54  ;;  %v1302_v56 = vsub.f32 %v1298_v55, %v1300_v24 }
 0xcee   :  { %v1317_v2 = vpop.permute.xlu0 %1316 }
 0xcef   :  { %v1306_v57 = vadd.f32 1e-05, %v1302_v56 }
 0xcf1   :  { %1782 = vrsqrt.f32 %v1306_v57 }
 0xcf2   :  { %v1323_v18 = vpop.permute.xlu0 %1322 }
 0xcf6   :  { %v1417_v34 = vpop.permute.xlu0 %1416 }
 0xcfa   :  { %v1781_v59 = vpop.eup %1780 }
 0xcfb   :  { %v1309_v63 = vmul.f32 %v1781_v59, %v1303_v58 }
 0xcfd   :  { %v1314_v4 = vmul.f32 %v1312_v61, %v1309_v63 }
 0xcfe   :  { %v1783_v5 = vpop.eup %1782 }
 0xcff   :  { %v1310_v6 = vmul.f32 %v1783_v5, %v1304_v3  ;;  %v1319_v60 = vadd.f32 %v1317_v2, %v1314_v4 }
 0xd01   :  { %v1315_v7 = vmul.f32 %v1312_v61, %v1310_v6  ;;  %1712 = vmatprep.mubr.msk.f32.mxu1 %vm85_vm0, %v1319_v60 }
 0xd03   :  { %v1320_v62 = vadd.f32 %v1317_v2, %v1315_v7 }
 0xd05   :  { %1713 = vmatmul.mubr.msk.f32.vlgmr.msra.gmra.mxu1 %vm85_vm0, %v1320_v62 }
 0xdc5   :  { %v1714_v20 = vpop.f32.mrf.mxu1 }
 0xdc6   :  { %v1403_v21 = vadd.f32 %v1714_v20, %v1323_v18 }
 0xdc7   :  { %v1397_v22 = vpop.f32.mrf.mxu1 }
 0xdc8   :  { %v1409_v23 = vmul.f32 0.70710677, %v1403_v21  ;;  %v1398_v25 = vadd.f32 %v1397_v22, %v1323_v18  ;;  %v1407_v31 = vmul.f32 0.5, %v1403_v21 }
 0xdca   :  { %1784 = verf.f32 %v1409_v23  ;;  %v1408_v26 = vmul.f32 0.70710677, %v1398_v25  ;;  %v1406_v29 = vmul.f32 0.5, %v1398_v25 }
 0xdcc   :  { %1786 = verf.f32 %v1408_v26 }
 0xdd7   :  { %v1785_v19 = vpop.eup %1784 }
 0xdd8   :  { %v1413_v28 = vadd.f32 1.0, %v1785_v19 }
 0xdd9   :  { %v1787_v27 = vpop.eup %1786 }
 0xdda   :  { %v1412_v30 = vadd.f32 1.0, %v1787_v27  ;;  %v1415_v33 = vmul.f32 %v1413_v28, %v1407_v31 }
 0xddc   :  { %v1414_v32 = vmul.f32 %v1412_v30, %v1406_v29 }
 0xdde   :  { %1731 = vmatprep.mubr.msk.f32.mxu0 %vm1419_vm4, %v1414_v32 }
 0xddf   :  { %1732 = vmatmul.mubr.msk.f32.vlgmr.msra.gmra.mxu0 %vm1419_vm4, %v1415_v33 }
 0xe9f   :  { %v1733_v35 = vpop.f32.mrf.mxu0 }
 0xea0   :  { %v1498_v37 = vadd.f32 %v1733_v35, %v1417_v34 }
 0xea1   :  { %v1492_v39 = vpop.f32.mrf.mxu0 }
 0xea2   :  { %v1502_v40 = vadd.f32 %v1498_v37, %v2030_v36  ;;  %v1493_v9 = vadd.f32 %v1492_v39, %v1417_v34 }
 0xea4   :  { %1504 = vst.msk [vmem:[#allocation8 + $0x8] sm:$0xff] %vm85_vm0, %v1502_v40  ;;  %v1501_v11 = vadd.f32 %v1493_v9, %v2033_v38 }
 0xea6   :  { %1503 = vst.msk [vmem:[#allocation8] sm:$0xff] %vm85_vm0, %v1501_v11 }
 0xea7   :  { %1839 = shalt.err (!%p1836_p0)
}
 0xea8   :  { %1516 = dma.vmem_to_hbm [thread:$0]  %s1511_s23, 256, %s2063_s2, [#allocation5], %s1855_s12, %s1855_s12, %s1856_s13  }
 0xea9   :  { %1852 = dma.done.wait [#allocation5], 256  }
 0xeaa   :  { %1853 = vsyncadd [#allocation5], 4294967040 }
 0xeab   :  { %1520 = vsyncpa [#allocation4], 1 }
 0xeac   :  { %1521 = vsyncpa [#allocation7], 1 }
 0xead   :  { %1522 = vsyncpa [#allocation5], 1 }

</bundles_post_ra>
